<compile_context>
chip_gen: v7x
topology: tpu7x:2x2x1
jax: 0.10.0
libtpu: 0.0.40
codegen_flags: <defaults>
</compile_context>

<pallas_src>
import functools

import jax
import jax.numpy as jnp
from jax.experimental import pallas as pl
from jax.experimental.pallas import tpu as pltpu


def stack_kernel(a_ref, pos_ref, w_ref, b_ref, g_ref, bt_ref, o_ref,
                 *, dilations, seq_len, eps=1e-5, slope=0.2):
    """Fused Stack forward.

    a_ref:   (C, B*L)  f32   activations, channels x flattened (batch, length)
    pos_ref: (1, B*L)  int32 within-sequence position of each column
    w_ref:   (nb, 3C, C) bf16 composed conv weights per block
                              rows [0:C)   -> tap applied to x[l-d]
                              rows [C:2C)  -> tap applied to x[l]
                              rows [2C:3C) -> tap applied to x[l+d]
    b_ref:   (nb, C, 1) f32  composed conv bias per block
    g_ref:   (nb, C, 1) f32  BatchNorm gamma per block
    bt_ref:  (nb, C, 1) f32  BatchNorm beta per block
    o_ref:   (C, B*L)  f32
    """
    C, BL = a_ref.shape
    a = a_ref[...]                       # f32 activation carried across blocks
    pos = pos_ref[...]                   # hoisted out of the block loop

    for i, d in enumerate(dilations):    # static unroll over blocks
        w = w_ref[i]                     # (3C, C) bf16
        bias = b_ref[i]                  # (C, 1) f32
        gamma = g_ref[i]
        beta = bt_ref[i]

        # One wide MXU matmul for all three composed taps: bf16 in, f32 out.
        z = jnp.dot(w, a.astype(jnp.bfloat16),
                    preferred_element_type=jnp.float32)       # (3C, BL)
        z_lo = z[0:C, :]          # contribution that must come from x[l-d]
        z_c = z[C:2 * C, :]       # contribution from x[l]
        z_hi = z[2 * C:3 * C, :]  # contribution that must come from x[l+d]

        # Align the +/-d taps with a lane roll (roll(x, s)[m] == x[m-s]) and
        # zero the zero-padding / cross-batch columns.
        h = z_c + bias
        h = h + jnp.where(pos >= d, pltpu.roll(z_lo, d, axis=1), 0.0)
        h = h + jnp.where(pos < seq_len - d,
                          pltpu.roll(z_hi, BL - d, axis=1), 0.0)

        # Residual + LeakyReLU(0.2)  (residual added before the activation,
        # exactly as in the PyTorch Block).
        y = h + a
        y = jnp.where(y >= 0.0, y, slope * y)

        # BatchNorm1d with training-mode batch statistics: per-channel
        # mean/var over (batch, length) == the lane axis, biased variance.
        m = jnp.mean(y, axis=1, keepdims=True)
        v = jnp.mean(jnp.square(y - m), axis=1, keepdims=True)
        a = (y - m) * jax.lax.rsqrt(v + eps) * gamma + beta

    o_ref[...] = a.astype(o_ref.dtype)


def prepare_stack_params(block_params):
    """Fold conv2 (1x1) into the three conv1 taps and pack per-block params.

    block_params: list of (w1, b1, w2, b2, gamma, beta) in PyTorch layouts:
        w1 (C, C, 3)  Conv1d(C, C, 3) weight   (out, in, k); k=0 -> x[l-d]
        b1 (C,)       Conv1d(C, C, 3) bias
        w2 (C, C, 1)  Conv1d(C, C, 1) weight
        b2 (C,)       Conv1d(C, C, 1) bias
        gamma, beta (C,)  BatchNorm1d affine
    """
    w_all, b_all, g_all, bt_all = [], [], [], []
    for (w1, b1, w2, b2, gamma, beta) in block_params:
        w2m = w2[:, :, 0]                                  # (C_out, C_in)
        taps = [w2m @ w1[:, :, k] for k in range(3)]       # composed (C, C) taps
        w_all.append(jnp.concatenate(taps, axis=0).astype(jnp.bfloat16))  # (3C, C)
        b_all.append((w2m @ b1 + b2)[:, None])             # (C, 1) composed bias
        g_all.append(gamma[:, None])
        bt_all.append(beta[:, None])
    return (jnp.stack(w_all), jnp.stack(b_all),
            jnp.stack(g_all), jnp.stack(bt_all))


def stack_forward(x_ncl, packed_params, dilations):
    """Stack forward.  x_ncl: (B, C, L) like PyTorch Conv1d; returns (B, C, L)."""
    B, C, L = x_ncl.shape
    w_all, b_all, g_all, bt_all = packed_params

    # Channels x flattened(batch, length): length is the lane axis inside the
    # kernel (dense stores, lane rolls, lane reductions).
    a = jnp.transpose(x_ncl, (1, 0, 2)).reshape(C, B * L).astype(jnp.float32)
    pos = (jnp.arange(B * L, dtype=jnp.int32) % L).reshape(1, B * L)

    full = lambda shape: pl.BlockSpec(shape, lambda: (0,) * len(shape),
                                      memory_space=pltpu.MemorySpace.VMEM)

    out = pl.pallas_call(
        functools.partial(stack_kernel, dilations=tuple(dilations), seq_len=L),
        out_shape=jax.ShapeDtypeStruct((C, B * L), jnp.float32),
        in_specs=[full((C, B * L)), full((1, B * L)),
                  full(w_all.shape), full(b_all.shape),
                  full(g_all.shape), full(bt_all.shape)],
        out_specs=full((C, B * L)),
    )(a, pos, w_all, b_all, g_all, bt_all)

    return jnp.transpose(out.reshape(C, B, L), (1, 0, 2))


def init_block_params(key, channels):
    """Deterministic synthetic params with PyTorch Conv1d/BatchNorm1d layouts."""
    k0, k1, k2, k3 = jax.random.split(key, 4)
    s3 = 1.0 / (3.0 * channels) ** 0.5     # Conv1d(k=3) fan-in scale
    s1 = 1.0 / (1.0 * channels) ** 0.5     # Conv1d(k=1) fan-in scale
    w1 = jax.random.uniform(k0, (channels, channels, 3), jnp.float32, -s3, s3)
    b1 = jax.random.uniform(k1, (channels,), jnp.float32, -s3, s3)
    w2 = jax.random.uniform(k2, (channels, channels, 1), jnp.float32, -s1, s1)
    b2 = jax.random.uniform(k3, (channels,), jnp.float32, -s1, s1)
    gamma = jnp.ones((channels,), jnp.float32)    # BatchNorm1d default init
    beta = jnp.zeros((channels,), jnp.float32)
    return (w1, b1, w2, b2, gamma, beta)


def stack_reference(x, block_params, dilations, eps=1e-5, slope=0.2):
    """Pure-JAX f32 reference, written directly from the PyTorch spec."""
    for (w1, b1, w2, b2, gamma, beta), d in zip(block_params, dilations):
        B, C, L = x.shape
        xp = jnp.pad(x, ((0, 0), (0, 0), (d, d)))
        h = b1[None, :, None]
        for k in range(3):
            h = h + jnp.einsum('oc,bcl->bol', w1[:, :, k],
                               xp[:, :, k * d:k * d + L])
        h = jnp.einsum('oc,bcl->bol', w2[:, :, 0], h) + b2[None, :, None]
        y = h + x
        y = jnp.where(y >= 0, y, slope * y)
        m = jnp.mean(y, axis=(0, 2), keepdims=True)
        v = jnp.mean((y - m) ** 2, axis=(0, 2), keepdims=True)
        x = (y - m) * jax.lax.rsqrt(v + eps) * gamma[None, :, None] \
            + beta[None, :, None]
    return x


if __name__ == "__main__":
    B, C, L = 2, 32, 64
    dilations = (1, 2, 4)

    root = jax.random.PRNGKey(0)
    kx, kp = jax.random.split(root)
    x = jax.random.normal(kx, (B, C, L), jnp.float32)

    pkeys = jax.random.split(kp, len(dilations))
    block_params = [init_block_params(k, C) for k in pkeys]
    packed = prepare_stack_params(block_params)

    out = jax.block_until_ready(stack_forward(x, packed, dilations))

    assert out.shape == (B, C, L), out.shape
    assert out.dtype == jnp.float32
    assert bool(jnp.all(jnp.isfinite(out)))

    # Loose sanity check vs the f32 reference (kernel matmuls run in bf16).
    ref = stack_reference(x, block_params, dilations)
    max_err = float(jnp.max(jnp.abs(out - ref)))
    assert max_err < 0.3, max_err

    print("KERNEL_OK")
</pallas_src>

<mosaic_0001>
module attributes {stable_mosaic.version = 11 : i64} {
  func.func @stack_kernel(%arg0: memref<32x128xf32, #tpu.memory_space<vmem>>, %arg1: memref<1x128xi32, #tpu.memory_space<vmem>>, %arg2: memref<3x96x32xbf16, #tpu.memory_space<vmem>>, %arg3: memref<3x32x1xf32, #tpu.memory_space<vmem>>, %arg4: memref<3x32x1xf32, #tpu.memory_space<vmem>>, %arg5: memref<3x32x1xf32, #tpu.memory_space<vmem>>, %arg6: memref<32x128xf32, #tpu.memory_space<vmem>>) attributes {dimension_semantics = [], scalar_prefetch = 0 : i64, scratch_operands = 0 : i64, tpu.core_type = #tpu.core_type<tc>} {
    %c0 = arith.constant 0 : index
    %c0_0 = arith.constant 0 : index
    %0 = vector.load %arg0[%c0, %c0_0] : memref<32x128xf32, #tpu.memory_space<vmem>>, vector<32x128xf32>
    %c0_1 = arith.constant 0 : index
    %c0_2 = arith.constant 0 : index
    %1 = vector.load %arg1[%c0_1, %c0_2] : memref<1x128xi32, #tpu.memory_space<vmem>>, vector<1x128xi32>
    %c0_3 = arith.constant 0 : index
    %c0_4 = arith.constant 0 : index
    %c0_5 = arith.constant 0 : index
    %2 = vector.load %arg2[%c0_3, %c0_4, %c0_5] : memref<3x96x32xbf16, #tpu.memory_space<vmem>>, vector<1x96x32xbf16>
    %3 = vector.shape_cast %2 : vector<1x96x32xbf16> to vector<96x32xbf16>
    %c0_6 = arith.constant 0 : index
    %c0_7 = arith.constant 0 : index
    %c0_8 = arith.constant 0 : index
    %4 = vector.load %arg3[%c0_6, %c0_7, %c0_8] : memref<3x32x1xf32, #tpu.memory_space<vmem>>, vector<1x32x1xf32>
    %5 = vector.shape_cast %4 : vector<1x32x1xf32> to vector<32x1xf32>
    %c0_9 = arith.constant 0 : index
    %c0_10 = arith.constant 0 : index
    %c0_11 = arith.constant 0 : index
    %6 = vector.load %arg4[%c0_9, %c0_10, %c0_11] : memref<3x32x1xf32, #tpu.memory_space<vmem>>, vector<1x32x1xf32>
    %7 = vector.shape_cast %6 : vector<1x32x1xf32> to vector<32x1xf32>
    %c0_12 = arith.constant 0 : index
    %c0_13 = arith.constant 0 : index
    %c0_14 = arith.constant 0 : index
    %8 = vector.load %arg5[%c0_12, %c0_13, %c0_14] : memref<3x32x1xf32, #tpu.memory_space<vmem>>, vector<1x32x1xf32>
    %9 = vector.shape_cast %8 : vector<1x32x1xf32> to vector<32x1xf32>
    %10 = arith.truncf %0 : vector<32x128xf32> to vector<32x128xbf16>
    %cst = arith.constant dense<0.000000e+00> : vector<96x128xf32>
    %11 = tpu.matmul %3, %10, %cst {dimension_numbers = #tpu.dot_dimension_numbers<[1], [0], [0], [1], [0, 0, 1, 1], [], []>} : vector<96x32xbf16>, vector<32x128xbf16>, vector<96x128xf32> -> vector<96x128xf32>
    %12 = vector.extract_strided_slice %11 {offsets = [0, 0], sizes = [32, 128], strides = [1, 1]} : vector<96x128xf32> to vector<32x128xf32>
    %13 = vector.extract_strided_slice %11 {offsets = [32, 0], sizes = [32, 128], strides = [1, 1]} : vector<96x128xf32> to vector<32x128xf32>
    %14 = vector.extract_strided_slice %11 {offsets = [64, 0], sizes = [32, 128], strides = [1, 1]} : vector<96x128xf32> to vector<32x128xf32>
    %15 = vector.broadcast %5 : vector<32x1xf32> to vector<32x128xf32>
    %16 = arith.addf %13, %15 : vector<32x128xf32>
    %c1_i32 = arith.constant 1 : i32
    %17 = vector.broadcast %c1_i32 : i32 to vector<1x128xi32>
    %18 = arith.cmpi sge, %1, %17 : vector<1x128xi32>
    %c1_i32_15 = arith.constant 1 : i32
    %19 = tpu.dynamic_rotate %12 by %c1_i32_15 dim 1 : vector<32x128xf32>, i32 -> vector<32x128xf32>
    %cst_16 = arith.constant 0.000000e+00 : f32
    %20 = vector.shape_cast %18 : vector<1x128xi1> to vector<1x128xi1>
    %21 = vector.broadcast %20 : vector<1x128xi1> to vector<32x128xi1>
    %22 = vector.broadcast %cst_16 : f32 to vector<32x128xf32>
    %23 = arith.select %21, %19, %22 : vector<32x128xi1>, vector<32x128xf32>
    %24 = arith.addf %16, %23 : vector<32x128xf32>
    %c63_i32 = arith.constant 63 : i32
    %25 = vector.broadcast %c63_i32 : i32 to vector<1x128xi32>
    %26 = arith.cmpi slt, %1, %25 : vector<1x128xi32>
    %c127_i32 = arith.constant 127 : i32
    %27 = tpu.dynamic_rotate %14 by %c127_i32 dim 1 : vector<32x128xf32>, i32 -> vector<32x128xf32>
    %cst_17 = arith.constant 0.000000e+00 : f32
    %28 = vector.shape_cast %26 : vector<1x128xi1> to vector<1x128xi1>
    %29 = vector.broadcast %28 : vector<1x128xi1> to vector<32x128xi1>
    %30 = vector.broadcast %cst_17 : f32 to vector<32x128xf32>
    %31 = arith.select %29, %27, %30 : vector<32x128xi1>, vector<32x128xf32>
    %32 = arith.addf %24, %31 : vector<32x128xf32>
    %33 = arith.addf %32, %0 : vector<32x128xf32>
    %cst_18 = arith.constant 0.000000e+00 : f32
    %34 = vector.broadcast %cst_18 : f32 to vector<32x128xf32>
    %35 = arith.cmpf oge, %33, %34 : vector<32x128xf32>
    %cst_19 = arith.constant 2.000000e-01 : f32
    %36 = vector.broadcast %cst_19 : f32 to vector<32x128xf32>
    %37 = arith.mulf %36, %33 : vector<32x128xf32>
    %38 = arith.select %35, %33, %37 : vector<32x128xi1>, vector<32x128xf32>
    %cst_20 = arith.constant dense<0.000000e+00> : vector<32xf32>
    %39 = vector.multi_reduction <add>, %38, %cst_20 [1] : vector<32x128xf32> to vector<32xf32>
    %40 = vector.shape_cast %39 : vector<32xf32> to vector<32x1xf32>
    %cst_21 = arith.constant 1.280000e+02 : f32
    %41 = vector.broadcast %cst_21 : f32 to vector<32x1xf32>
    %42 = arith.divf %40, %41 : vector<32x1xf32>
    %43 = vector.broadcast %42 : vector<32x1xf32> to vector<32x128xf32>
    %44 = arith.subf %38, %43 : vector<32x128xf32>
    %45 = arith.mulf %44, %44 : vector<32x128xf32>
    %cst_22 = arith.constant dense<0.000000e+00> : vector<32xf32>
    %46 = vector.multi_reduction <add>, %45, %cst_22 [1] : vector<32x128xf32> to vector<32xf32>
    %47 = vector.shape_cast %46 : vector<32xf32> to vector<32x1xf32>
    %cst_23 = arith.constant 1.280000e+02 : f32
    %48 = vector.broadcast %cst_23 : f32 to vector<32x1xf32>
    %49 = arith.divf %47, %48 : vector<32x1xf32>
    %50 = vector.broadcast %42 : vector<32x1xf32> to vector<32x128xf32>
    %51 = arith.subf %38, %50 : vector<32x128xf32>
    %cst_24 = arith.constant 9.99999974E-6 : f32
    %52 = vector.broadcast %cst_24 : f32 to vector<32x1xf32>
    %53 = arith.addf %49, %52 : vector<32x1xf32>
    %54 = math.rsqrt %53 : vector<32x1xf32>
    %55 = vector.broadcast %54 : vector<32x1xf32> to vector<32x128xf32>
    %56 = arith.mulf %51, %55 : vector<32x128xf32>
    %57 = vector.broadcast %7 : vector<32x1xf32> to vector<32x128xf32>
    %58 = arith.mulf %56, %57 : vector<32x128xf32>
    %59 = vector.broadcast %9 : vector<32x1xf32> to vector<32x128xf32>
    %60 = arith.addf %58, %59 : vector<32x128xf32>
    %c1 = arith.constant 1 : index
    %c0_25 = arith.constant 0 : index
    %c0_26 = arith.constant 0 : index
    %61 = vector.load %arg2[%c1, %c0_25, %c0_26] : memref<3x96x32xbf16, #tpu.memory_space<vmem>>, vector<1x96x32xbf16>
    %62 = vector.shape_cast %61 : vector<1x96x32xbf16> to vector<96x32xbf16>
    %c1_27 = arith.constant 1 : index
    %c0_28 = arith.constant 0 : index
    %c0_29 = arith.constant 0 : index
    %63 = vector.load %arg3[%c1_27, %c0_28, %c0_29] : memref<3x32x1xf32, #tpu.memory_space<vmem>>, vector<1x32x1xf32>
    %64 = vector.shape_cast %63 : vector<1x32x1xf32> to vector<32x1xf32>
    %c1_30 = arith.constant 1 : index
    %c0_31 = arith.constant 0 : index
    %c0_32 = arith.constant 0 : index
    %65 = vector.load %arg4[%c1_30, %c0_31, %c0_32] : memref<3x32x1xf32, #tpu.memory_space<vmem>>, vector<1x32x1xf32>
    %66 = vector.shape_cast %65 : vector<1x32x1xf32> to vector<32x1xf32>
    %c1_33 = arith.constant 1 : index
    %c0_34 = arith.constant 0 : index
    %c0_35 = arith.constant 0 : index
    %67 = vector.load %arg5[%c1_33, %c0_34, %c0_35] : memref<3x32x1xf32, #tpu.memory_space<vmem>>, vector<1x32x1xf32>
    %68 = vector.shape_cast %67 : vector<1x32x1xf32> to vector<32x1xf32>
    %69 = arith.truncf %60 : vector<32x128xf32> to vector<32x128xbf16>
    %cst_36 = arith.constant dense<0.000000e+00> : vector<96x128xf32>
    %70 = tpu.matmul %62, %69, %cst_36 {dimension_numbers = #tpu.dot_dimension_numbers<[1], [0], [0], [1], [0, 0, 1, 1], [], []>} : vector<96x32xbf16>, vector<32x128xbf16>, vector<96x128xf32> -> vector<96x128xf32>
    %71 = vector.extract_strided_slice %70 {offsets = [0, 0], sizes = [32, 128], strides = [1, 1]} : vector<96x128xf32> to vector<32x128xf32>
    %72 = vector.extract_strided_slice %70 {offsets = [32, 0], sizes = [32, 128], strides = [1, 1]} : vector<96x128xf32> to vector<32x128xf32>
    %73 = vector.extract_strided_slice %70 {offsets = [64, 0], sizes = [32, 128], strides = [1, 1]} : vector<96x128xf32> to vector<32x128xf32>
    %74 = vector.broadcast %64 : vector<32x1xf32> to vector<32x128xf32>
    %75 = arith.addf %72, %74 : vector<32x128xf32>
    %c2_i32 = arith.constant 2 : i32
    %76 = vector.broadcast %c2_i32 : i32 to vector<1x128xi32>
    %77 = arith.cmpi sge, %1, %76 : vector<1x128xi32>
    %c2_i32_37 = arith.constant 2 : i32
    %78 = tpu.dynamic_rotate %71 by %c2_i32_37 dim 1 : vector<32x128xf32>, i32 -> vector<32x128xf32>
    %cst_38 = arith.constant 0.000000e+00 : f32
    %79 = vector.shape_cast %77 : vector<1x128xi1> to vector<1x128xi1>
    %80 = vector.broadcast %79 : vector<1x128xi1> to vector<32x128xi1>
    %81 = vector.broadcast %cst_38 : f32 to vector<32x128xf32>
    %82 = arith.select %80, %78, %81 : vector<32x128xi1>, vector<32x128xf32>
    %83 = arith.addf %75, %82 : vector<32x128xf32>
    %c62_i32 = arith.constant 62 : i32
    %84 = vector.broadcast %c62_i32 : i32 to vector<1x128xi32>
    %85 = arith.cmpi slt, %1, %84 : vector<1x128xi32>
    %c126_i32 = arith.constant 126 : i32
    %86 = tpu.dynamic_rotate %73 by %c126_i32 dim 1 : vector<32x128xf32>, i32 -> vector<32x128xf32>
    %cst_39 = arith.constant 0.000000e+00 : f32
    %87 = vector.shape_cast %85 : vector<1x128xi1> to vector<1x128xi1>
    %88 = vector.broadcast %87 : vector<1x128xi1> to vector<32x128xi1>
    %89 = vector.broadcast %cst_39 : f32 to vector<32x128xf32>
    %90 = arith.select %88, %86, %89 : vector<32x128xi1>, vector<32x128xf32>
    %91 = arith.addf %83, %90 : vector<32x128xf32>
    %92 = arith.addf %91, %60 : vector<32x128xf32>
    %cst_40 = arith.constant 0.000000e+00 : f32
    %93 = vector.broadcast %cst_40 : f32 to vector<32x128xf32>
    %94 = arith.cmpf oge, %92, %93 : vector<32x128xf32>
    %cst_41 = arith.constant 2.000000e-01 : f32
    %95 = vector.broadcast %cst_41 : f32 to vector<32x128xf32>
    %96 = arith.mulf %95, %92 : vector<32x128xf32>
    %97 = arith.select %94, %92, %96 : vector<32x128xi1>, vector<32x128xf32>
    %cst_42 = arith.constant dense<0.000000e+00> : vector<32xf32>
    %98 = vector.multi_reduction <add>, %97, %cst_42 [1] : vector<32x128xf32> to vector<32xf32>
    %99 = vector.shape_cast %98 : vector<32xf32> to vector<32x1xf32>
    %cst_43 = arith.constant 1.280000e+02 : f32
    %100 = vector.broadcast %cst_43 : f32 to vector<32x1xf32>
    %101 = arith.divf %99, %100 : vector<32x1xf32>
    %102 = vector.broadcast %101 : vector<32x1xf32> to vector<32x128xf32>
    %103 = arith.subf %97, %102 : vector<32x128xf32>
    %104 = arith.mulf %103, %103 : vector<32x128xf32>
    %cst_44 = arith.constant dense<0.000000e+00> : vector<32xf32>
    %105 = vector.multi_reduction <add>, %104, %cst_44 [1] : vector<32x128xf32> to vector<32xf32>
    %106 = vector.shape_cast %105 : vector<32xf32> to vector<32x1xf32>
    %cst_45 = arith.constant 1.280000e+02 : f32
    %107 = vector.broadcast %cst_45 : f32 to vector<32x1xf32>
    %108 = arith.divf %106, %107 : vector<32x1xf32>
    %109 = vector.broadcast %101 : vector<32x1xf32> to vector<32x128xf32>
    %110 = arith.subf %97, %109 : vector<32x128xf32>
    %cst_46 = arith.constant 9.99999974E-6 : f32
    %111 = vector.broadcast %cst_46 : f32 to vector<32x1xf32>
    %112 = arith.addf %108, %111 : vector<32x1xf32>
    %113 = math.rsqrt %112 : vector<32x1xf32>
    %114 = vector.broadcast %113 : vector<32x1xf32> to vector<32x128xf32>
    %115 = arith.mulf %110, %114 : vector<32x128xf32>
    %116 = vector.broadcast %66 : vector<32x1xf32> to vector<32x128xf32>
    %117 = arith.mulf %115, %116 : vector<32x128xf32>
    %118 = vector.broadcast %68 : vector<32x1xf32> to vector<32x128xf32>
    %119 = arith.addf %117, %118 : vector<32x128xf32>
    %c2 = arith.constant 2 : index
    %c0_47 = arith.constant 0 : index
    %c0_48 = arith.constant 0 : index
    %120 = vector.load %arg2[%c2, %c0_47, %c0_48] : memref<3x96x32xbf16, #tpu.memory_space<vmem>>, vector<1x96x32xbf16>
    %121 = vector.shape_cast %120 : vector<1x96x32xbf16> to vector<96x32xbf16>
    %c2_49 = arith.constant 2 : index
    %c0_50 = arith.constant 0 : index
    %c0_51 = arith.constant 0 : index
    %122 = vector.load %arg3[%c2_49, %c0_50, %c0_51] : memref<3x32x1xf32, #tpu.memory_space<vmem>>, vector<1x32x1xf32>
    %123 = vector.shape_cast %122 : vector<1x32x1xf32> to vector<32x1xf32>
    %c2_52 = arith.constant 2 : index
    %c0_53 = arith.constant 0 : index
    %c0_54 = arith.constant 0 : index
    %124 = vector.load %arg4[%c2_52, %c0_53, %c0_54] : memref<3x32x1xf32, #tpu.memory_space<vmem>>, vector<1x32x1xf32>
    %125 = vector.shape_cast %124 : vector<1x32x1xf32> to vector<32x1xf32>
    %c2_55 = arith.constant 2 : index
    %c0_56 = arith.constant 0 : index
    %c0_57 = arith.constant 0 : index
    %126 = vector.load %arg5[%c2_55, %c0_56, %c0_57] : memref<3x32x1xf32, #tpu.memory_space<vmem>>, vector<1x32x1xf32>
    %127 = vector.shape_cast %126 : vector<1x32x1xf32> to vector<32x1xf32>
    %128 = arith.truncf %119 : vector<32x128xf32> to vector<32x128xbf16>
    %cst_58 = arith.constant dense<0.000000e+00> : vector<96x128xf32>
    %129 = tpu.matmul %121, %128, %cst_58 {dimension_numbers = #tpu.dot_dimension_numbers<[1], [0], [0], [1], [0, 0, 1, 1], [], []>} : vector<96x32xbf16>, vector<32x128xbf16>, vector<96x128xf32> -> vector<96x128xf32>
    %130 = vector.extract_strided_slice %129 {offsets = [0, 0], sizes = [32, 128], strides = [1, 1]} : vector<96x128xf32> to vector<32x128xf32>
    %131 = vector.extract_strided_slice %129 {offsets = [32, 0], sizes = [32, 128], strides = [1, 1]} : vector<96x128xf32> to vector<32x128xf32>
    %132 = vector.extract_strided_slice %129 {offsets = [64, 0], sizes = [32, 128], strides = [1, 1]} : vector<96x128xf32> to vector<32x128xf32>
    %133 = vector.broadcast %123 : vector<32x1xf32> to vector<32x128xf32>
    %134 = arith.addf %131, %133 : vector<32x128xf32>
    %c4_i32 = arith.constant 4 : i32
    %135 = vector.broadcast %c4_i32 : i32 to vector<1x128xi32>
    %136 = arith.cmpi sge, %1, %135 : vector<1x128xi32>
    %c4_i32_59 = arith.constant 4 : i32
    %137 = tpu.dynamic_rotate %130 by %c4_i32_59 dim 1 : vector<32x128xf32>, i32 -> vector<32x128xf32>
    %cst_60 = arith.constant 0.000000e+00 : f32
    %138 = vector.shape_cast %136 : vector<1x128xi1> to vector<1x128xi1>
    %139 = vector.broadcast %138 : vector<1x128xi1> to vector<32x128xi1>
    %140 = vector.broadcast %cst_60 : f32 to vector<32x128xf32>
    %141 = arith.select %139, %137, %140 : vector<32x128xi1>, vector<32x128xf32>
    %142 = arith.addf %134, %141 : vector<32x128xf32>
    %c60_i32 = arith.constant 60 : i32
    %143 = vector.broadcast %c60_i32 : i32 to vector<1x128xi32>
    %144 = arith.cmpi slt, %1, %143 : vector<1x128xi32>
    %c124_i32 = arith.constant 124 : i32
    %145 = tpu.dynamic_rotate %132 by %c124_i32 dim 1 : vector<32x128xf32>, i32 -> vector<32x128xf32>
    %cst_61 = arith.constant 0.000000e+00 : f32
    %146 = vector.shape_cast %144 : vector<1x128xi1> to vector<1x128xi1>
    %147 = vector.broadcast %146 : vector<1x128xi1> to vector<32x128xi1>
    %148 = vector.broadcast %cst_61 : f32 to vector<32x128xf32>
    %149 = arith.select %147, %145, %148 : vector<32x128xi1>, vector<32x128xf32>
    %150 = arith.addf %142, %149 : vector<32x128xf32>
    %151 = arith.addf %150, %119 : vector<32x128xf32>
    %cst_62 = arith.constant 0.000000e+00 : f32
    %152 = vector.broadcast %cst_62 : f32 to vector<32x128xf32>
    %153 = arith.cmpf oge, %151, %152 : vector<32x128xf32>
    %cst_63 = arith.constant 2.000000e-01 : f32
    %154 = vector.broadcast %cst_63 : f32 to vector<32x128xf32>
    %155 = arith.mulf %154, %151 : vector<32x128xf32>
    %156 = arith.select %153, %151, %155 : vector<32x128xi1>, vector<32x128xf32>
    %cst_64 = arith.constant dense<0.000000e+00> : vector<32xf32>
    %157 = vector.multi_reduction <add>, %156, %cst_64 [1] : vector<32x128xf32> to vector<32xf32>
    %158 = vector.shape_cast %157 : vector<32xf32> to vector<32x1xf32>
    %cst_65 = arith.constant 1.280000e+02 : f32
    %159 = vector.broadcast %cst_65 : f32 to vector<32x1xf32>
    %160 = arith.divf %158, %159 : vector<32x1xf32>
    %161 = vector.broadcast %160 : vector<32x1xf32> to vector<32x128xf32>
    %162 = arith.subf %156, %161 : vector<32x128xf32>
    %163 = arith.mulf %162, %162 : vector<32x128xf32>
    %cst_66 = arith.constant dense<0.000000e+00> : vector<32xf32>
    %164 = vector.multi_reduction <add>, %163, %cst_66 [1] : vector<32x128xf32> to vector<32xf32>
    %165 = vector.shape_cast %164 : vector<32xf32> to vector<32x1xf32>
    %cst_67 = arith.constant 1.280000e+02 : f32
    %166 = vector.broadcast %cst_67 : f32 to vector<32x1xf32>
    %167 = arith.divf %165, %166 : vector<32x1xf32>
    %168 = vector.broadcast %160 : vector<32x1xf32> to vector<32x128xf32>
    %169 = arith.subf %156, %168 : vector<32x128xf32>
    %cst_68 = arith.constant 9.99999974E-6 : f32
    %170 = vector.broadcast %cst_68 : f32 to vector<32x1xf32>
    %171 = arith.addf %167, %170 : vector<32x1xf32>
    %172 = math.rsqrt %171 : vector<32x1xf32>
    %173 = vector.broadcast %172 : vector<32x1xf32> to vector<32x128xf32>
    %174 = arith.mulf %169, %173 : vector<32x128xf32>
    %175 = vector.broadcast %125 : vector<32x1xf32> to vector<32x128xf32>
    %176 = arith.mulf %174, %175 : vector<32x128xf32>
    %177 = vector.broadcast %127 : vector<32x1xf32> to vector<32x128xf32>
    %178 = arith.addf %176, %177 : vector<32x128xf32>
    %c0_69 = arith.constant 0 : index
    %c0_70 = arith.constant 0 : index
    %179 = vector.load %arg6[%c0_69, %c0_70] : memref<32x128xf32, #tpu.memory_space<vmem>>, vector<32x128xf32>
    tpu.vector_store %arg6[%c0_69, %c0_70], %178 {strides = array<i32>} : memref<32x128xf32, #tpu.memory_space<vmem>>, vector<32x128xf32>,
    return
  }
}

</mosaic_0001>

<bundles_post_ra>
// kernel: tpu_custom_call.1
= control target key start
LH: loop header
LB: loop body
LE: loop exit
PB: predicated region body
PF: predicated region fallthrough
CT: control target
= control target key end

     0   :  { %v1297_v5 = vmov 0   ;;  %vm86_vm0 = vcmask 261120   ;;  %s1693_s0 = inlined_call_operand.vmem [shape: f32[32,128], index: 0, kind: input, shape index: {}]   ;;  %s1694_s1 = inlined_call_operand.vmem [shape: s32[1,128], index: 1, kind: input, shape index: {}]   ;;  %s1695_s2 = inlined_call_operand.vmem [shape: bf16[3,96,32], index: 2, kind: input, shape index: {}]   ;;  %s1696_s3 = inlined_call_operand.vmem [shape: f32[3,32,1], index: 3, kind: input, shape index: {}]   ;;  %s1697_s4 = inlined_call_operand.vmem [shape: f32[3,32,1], index: 4, kind: input, shape index: {}]   ;;  %s1698_s5 = inlined_call_operand.vmem [shape: f32[3,32,1], index: 5, kind: input, shape index: {}]   ;;  %s1699_s6 = inlined_call_operand.hbm [shape: f32[32,128], index: 6, kind: output, shape index: {}]  }
   0x1   :  { %v1345_v0 = vld [vmem:[%s1693_s0] sm:$0xff]  ;;  %v1350_v1 = vld [vmem:[%s1693_s0 + $0x8] sm:$0xff]  ;;  %v1355_v2 = vld [vmem:[%s1693_s0 + $0x10] sm:$0xff]  ;;  %1230 = vset.pattern.permute.xlu1 %v1297_v5  ;;  %1229 = vset.pattern.permute.xlu0 %v1297_v5 }
   0x2   :  { %v54_v3 = vpack.c.bf16 %v1350_v1, %v1345_v0  ;;  %v1362_v4 = vld [vmem:[%s1693_s0 + $0x18] sm:$0xff]  ;;  %v1231_v7 = vld [vmem:[%s1695_s2] sm:$0xff]   ;;  %v1232_v8 = vld [vmem:[%s1695_s2 + $0x10] sm:$0xff]  }
   0x3   :  { %v55_v6 = vpack.c.bf16 %v1362_v4, %v1355_v2  ;;  %v1233_v9 = vld [vmem:[%s1695_s2 + $0x8] sm:$0xff]   ;;  %1171 = vmatprep.mubr.msk.bf16.mxu0 %vm86_vm0, %v1231_v7  ;;  %1175 = vmatprep.mubr.msk.bf16.mxu1 %vm86_vm0, %v1232_v8  ;;  %v1234_v10 = vld [vmem:[%s1695_s2 + $0x18] sm:$0xff]   ;;  %v1235_v11 = vld [vmem:[%s1695_s2 + $0x20] sm:$0xff]  }
   0x4   :  { %1167 = vmatprep.subr.bf16.mxu0 %v54_v3  ;;  %1215 = vmatprep.subr.bf16.mxu1 %v54_v3  ;;  %v44_v12 = vld [vmem:[%s1696_s3 + $0x10] sm:$0xff]  ;;  %v42_v13 = vld [vmem:[%s1696_s3] sm:$0xff]  ;;  %v45_v14 = vld [vmem:[%s1696_s3 + $0x18] sm:$0xff] }
   0x5   :  { %1168 = vmatpush3.bf16.msra.mxu0 %v54_v3  ;;  %1217 = vmatpush3.bf16.msra.mxu1 %v54_v3  ;;  %v43_v15 = vld [vmem:[%s1696_s3 + $0x8] sm:$0xff] }
   0x6   :  { %1169 = vmatprep.subr.bf16.mxu0 %v55_v6  ;;  %1216 = vmatprep.subr.bf16.mxu1 %v55_v6  ;;  %v1236_v16 = vld [vmem:[%s1695_s2 + $0x28] sm:$0xff]  }
   0x7   :  { %198 = vperm.xlu1 %1230, %v44_v12   ;;  %188 = vperm.xlu0 %1229, %v42_v13  }
   0x9   :  { %1170 = vmatpush3.bf16.msra.mxu0 %v55_v6  ;;  %1218 = vmatpush3.bf16.msra.mxu1 %v55_v6 }
   0xb   :  { %203 = vperm.xlu1 %1230, %v45_v14   ;;  %193 = vperm.xlu0 %1229, %v43_v15  }
   0xc   :  { %1172 = vmatmul.mubr.msk.bf16.vlgmr.msra.gmra.mrb[0].mxu0 %vm86_vm0, %v1233_v9  ;;  %1176 = vmatmul.mubr.msk.bf16.vlgmr.msra.gmra.mrb[0].mxu1 %vm86_vm0, %v1234_v10 }
   0xd   :  { %1179 = vmatprep.mubr.msk.bf16.mxu1 %vm86_vm0, %v1235_v11 }
   0xe   :  { %11 = vsyncpa [#allocation3], 0  ;;  %s1298_s24 = smov 1   ;;  %s1299_s25 = smov 127   ;;  %v220_v29 = vlaneseq  ;;  %v1407_v32 = vld [vmem:[%s1694_s1] sm:$0x1] }
   0xf   :  { %vm210_vm1 = vcmp.ge.s32.totalorder %v1407_v32, 1  ;;  %vm233_vm2 = vcmp.lt.s32.totalorder %v1407_v32, 63  ;;  %v53_v44 = vld [vmem:[%s1698_s5 + $0x18] sm:$0xff]  ;;  %v1083_v48 = vld [vmem:[%s1696_s3 + $0x20] sm:$0xff]  ;;  %s1300_s12 = smov 2   ;;  %s1301_s13 = smov 126  }
  0x10   :  { %v221_v33 = vshrl.u32 %v220_v29, 7  ;;  %v219_v37 = vsel %vm210_vm1, 1, %v1297_v5  ;;  %v242_v39 = vsel %vm233_vm2, 1, %v1297_v5  ;;  %vm548_vm9 = vcmp.ge.s32.totalorder %v1407_v32, 2  ;;  %s1302_s23 = smov 4  }
  0x11   :  { %vm571_vm10 = vcmp.lt.s32.totalorder %v1407_v32, 62  ;;  %vm908_vm2 = vcmp.lt.s32.totalorder %v1407_v32, 60 }
  0x12   :  { %v1410_v35 = vsub.s32 0, %v221_v33 }
  0x14   :  { %1180 = vmatmul.mubr.msk.bf16.gmra.mrb[4].mxu1 %vm86_vm0, %v1236_v16  ;;  %v223_v40 = vrot.slane %v219_v37, %v1410_v35  ;;  %v246_v42 = vrot.slane %v242_v39, %v1410_v35 }
  0x16   :  { %vm1417_vm3 = vcmp.eq.s32.totalorder %v223_v40, 1  ;;  %vm1423_vm4 = vcmp.eq.s32.totalorder %v246_v42, 1 }
  0x86   :  { %v189_v30 = vpop.permute.xlu0 %188  ;;  %v199_v31 = vpop.permute.xlu1 %198 }
  0x8a   :  { %v194_v34 = vpop.permute.xlu0 %193  ;;  %v204_v36 = vpop.permute.xlu1 %203 }
  0xdf   :  { %v1173_v17 = vpop.f32.mrb[0].mxu0  ;;  %v1177_v18 = vpop.f32.mrb[0].mxu1 }
  0xe0   :  { %v155_v19 = vpop.f32.mrb[1].mxu1  ;;  %215 = vrot.lane.b32.xlu0 %v1173_v17, %s1298_s24  ;;  %v139_v20 = vpop.f32.mrb[1].mxu0  ;;  %v208_v55 = vadd.f32 %v1177_v18, %v199_v31 }
  0xe1   :  { %v1174_v21 = vpop.f32.mrb[2].mxu0  ;;  %v1178_v22 = vpop.f32.mrb[2].mxu1  ;;  %v206_v47 = vadd.f32 %v189_v30, %v155_v19 }
  0xe2   :  { %v158_v23 = vpop.f32.mrb[3].mxu1  ;;  %217 = vrot.lane.b32.xlu1 %v1174_v21, %s1298_s24  ;;  %v142_v24 = vpop.f32.mrb[3].mxu0  ;;  %v209_v60 = vadd.f32 %v1178_v22, %v204_v36  ;;  %v50_v22 = vld [vmem:[%s1698_s5] sm:$0xff] }
  0xe3   :  { %v207_v50 = vadd.f32 %v194_v34, %v158_v23  ;;  %v47_v23 = vld [vmem:[%s1697_s4 + $0x8] sm:$0xff] }
  0xe4   :  { %211 = vrot.lane.b32.xlu0 %v139_v20, %s1298_s24 }
  0xe6   :  { %213 = vrot.lane.b32.xlu1 %v142_v24, %s1298_s24  ;;  %v49_v24 = vld [vmem:[%s1697_s4 + $0x18] sm:$0xff]  ;;  %s1303_s24 = smov 124  }
  0xe7   :  { %v1181_v25 = vpop.f32.mrb[4].mxu1 }
  0xe8   :  { %v171_v26 = vpop.f32.mrb[5].mxu1 }
  0xe9   :  { %v1182_v27 = vpop.f32.mrb[6].mxu1  ;;  %234 = vrot.lane.b32.xlu0 %v171_v26, %s1299_s25 }
  0xea   :  { %v174_v28 = vpop.f32.mrb[7].mxu1 }
  0xeb   :  { %236 = vrot.lane.b32.xlu1 %v174_v28, %s1299_s25 }
  0xed   :  { %238 = vrot.lane.b32.xlu0 %v1181_v25, %s1299_s25  ;;  %v48_v25 = vld [vmem:[%s1697_s4 + $0x10] sm:$0xff] }
  0xef   :  { %240 = vrot.lane.b32.xlu1 %v1182_v27, %s1299_s25 }
 0x152   :  { %v216_v38 = vpop.permute.xlu0 %215 }
 0x153   :  { %v227_v53 = vsel %vm1417_vm3, %v216_v38, 0.0 }
 0x154   :  { %v218_v41 = vpop.permute.xlu1 %217  ;;  %v231_v62 = vadd.f32 %v227_v53, %v208_v55 }
 0x155   :  { %v228_v56 = vsel %vm1417_vm3, %v218_v41, 0.0 }
 0x156   :  { %v212_v43 = vpop.permute.xlu0 %211  ;;  %v232_v7 = vadd.f32 %v228_v56, %v209_v60 }
 0x157   :  { %v225_v45 = vsel %vm1417_vm3, %v212_v43, 0.0 }
 0x158   :  { %v214_v46 = vpop.permute.xlu1 %213  ;;  %v229_v51 = vadd.f32 %v225_v45, %v206_v47  ;;  %v1084_v45 = vld [vmem:[%s1696_s3 + $0x28] sm:$0xff]  ;;  %v52_v47 = vld [vmem:[%s1698_s5 + $0x10] sm:$0xff] }
 0x159   :  { %v226_v49 = vsel %vm1417_vm3, %v214_v46, 0.0  ;;  %v1086_v46 = vld [vmem:[%s1696_s3 + $0x38] sm:$0xff] }
 0x15a   :  { %v230_v57 = vadd.f32 %v226_v49, %v207_v50  ;;  %v1085_v49 = vld [vmem:[%s1696_s3 + $0x30] sm:$0xff] }
 0x15b   :  { %v235_v52 = vpop.permute.xlu0 %234  ;;  %v1237_v50 = vld [vmem:[%s1695_s2 + $0x30] sm:$0xff]  }
 0x15c   :  { %v248_v54 = vsel %vm1423_vm4, %v235_v52, 0.0  ;;  %1187 = vmatprep.mubr.msk.bf16.mxu1 %vm86_vm0, %v1237_v50  ;;  %v557_v50 = vsel %vm548_vm9, 1, %v1297_v5 }
 0x15d   :  { %v252_v58 = vadd.f32 %v248_v54, %v229_v51  ;;  %v237_v59 = vpop.permute.xlu1 %236 }
 0x15e   :  { %v249_v61 = vsel %vm1423_vm4, %v237_v59, 0.0 }
 0x15f   :  { %v256_v63 = vadd.f32 %v252_v58, %v1345_v0  ;;  %v253_v3 = vadd.f32 %v249_v61, %v230_v57  ;;  %v239_v6 = vpop.permute.xlu0 %238 }
 0x160   :  { %v250_v8 = vsel %vm1423_vm4, %v239_v6, 0.0 }
 0x161   :  { %v257_v9 = vadd.f32 %v253_v3, %v1350_v1  ;;  %v254_v10 = vadd.f32 %v250_v8, %v231_v62  ;;  %v241_v11 = vpop.permute.xlu1 %240  ;;  %vm260_vm5 = vcmp.ge.f32.partialorder %v256_v63, 0.0  ;;  %v264_v12 = vmul.f32 0.2, %v256_v63 }
 0x162   :  { %v251_v13 = vsel %vm1423_vm4, %v241_v11, 0.0 }
 0x163   :  { %v258_v14 = vadd.f32 %v254_v10, %v1355_v2  ;;  %v255_v15 = vadd.f32 %v251_v13, %v232_v7  ;;  %v268_v16 = vsel %vm260_vm5, %v256_v63, %v264_v12  ;;  %vm261_vm6 = vcmp.ge.f32.partialorder %v257_v9, 0.0  ;;  %v46_v2 = vld [vmem:[%s1697_s4] sm:$0xff] }
 0x164   :  { %272 = vadd.xlane.f32.xlu0 %v268_v16  ;;  %v265_v0 = vmul.f32 0.2, %v257_v9 }
 0x165   :  { %v259_v17 = vadd.f32 %v255_v15, %v1362_v4  ;;  %vm262_vm7 = vcmp.ge.f32.partialorder %v258_v14, 0.0  ;;  %v266_v18 = vmul.f32 0.2, %v258_v14  ;;  %v51_v4 = vld [vmem:[%s1698_s5 + $0x8] sm:$0xff] }
 0x166   :  { %v269_v19 = vsel %vm261_vm6, %v257_v9, %v265_v0 }
 0x167   :  { %274 = vadd.xlane.f32.xlu1 %v269_v19  ;;  %v270_v1 = vsel %vm262_vm7, %v258_v14, %v266_v18  ;;  %v267_v20 = vmul.f32 0.2, %v259_v17  ;;  %vm263_vm8 = vcmp.ge.f32.partialorder %v259_v17, 0.0 }
 0x168   :  { %276 = vadd.xlane.f32.xlu0 %v270_v1 }
 0x169   :  { %v271_v21 = vsel %vm263_vm8, %v259_v17, %v267_v20 }
 0x16c   :  { %278 = vadd.xlane.f32.xlu0 %v271_v21 }
 0x178   :  { %319 = vperm.xlu1 %1230, %v46_v2  }
 0x17c   :  { %343 = vperm.xlu1 %1230, %v50_v22  }
 0x180   :  { %348 = vperm.xlu1 %1230, %v51_v4  }
 0x182   :  { %324 = vperm.xlu0 %1229, %v47_v23  }
 0x184   :  { %334 = vperm.xlu1 %1230, %v49_v24  }
 0x186   :  { %329 = vperm.xlu0 %1229, %v48_v25  }
 0x1f1   :  { %v273_v26 = vpop.xlane.xlu0 %272 }
 0x1f2   :  { %v281_v28 = vmul.f32 0.0078125, %v273_v26  ;;  %v1238_v26 = vld [vmem:[%s1695_s2 + $0x38] sm:$0xff]  }
 0x1f4   :  { %v275_v30 = vpop.xlane.xlu1 %274  ;;  %v285_v34 = vsub.f32 %v268_v16, %v281_v28  ;;  %v1240_v28 = vld [vmem:[%s1695_s2 + $0x48] sm:$0xff]  }
 0x1f5   :  { %v277_v27 = vpop.xlane.xlu0 %276  ;;  %v282_v36 = vmul.f32 0.0078125, %v275_v30  ;;  %v1242_v30 = vld [vmem:[%s1695_s2 + $0x58] sm:$0xff]  }
 0x1f6   :  { %v283_v29 = vmul.f32 0.0078125, %v277_v27  ;;  %v289_v41 = vmul.f32 %v285_v34, %v285_v34  ;;  %v1239_v27 = vld [vmem:[%s1695_s2 + $0x40] sm:$0xff]  }
 0x1f7   :  { %v286_v40 = vsub.f32 %v269_v19, %v282_v36 }
 0x1f8   :  { %v287_v31 = vsub.f32 %v270_v1, %v283_v29  ;;  %v320_v51 = vpop.permute.xlu1 %319  ;;  %v1241_v29 = vld [vmem:[%s1695_s2 + $0x50] sm:$0xff]  }
 0x1f9   :  { %v279_v33 = vpop.xlane.xlu0 %278  ;;  %v290_v43 = vmul.f32 %v286_v40, %v286_v40 }
 0x1fa   :  { %v284_v37 = vmul.f32 0.0078125, %v279_v33  ;;  %v291_v38 = vmul.f32 %v287_v31, %v287_v31 }
 0x1fc   :  { %v288_v39 = vsub.f32 %v271_v21, %v284_v37  ;;  %297 = vadd.xlane.f32.xlu1 %v291_v38  ;;  %v344_v52 = vpop.permute.xlu1 %343 }
 0x1fe   :  { %v292_v42 = vmul.f32 %v288_v39, %v288_v39 }
 0x200   :  { %293 = vadd.xlane.f32.xlu1 %v289_v41  ;;  %299 = vadd.xlane.f32.xlu0 %v292_v42  ;;  %v349_v53 = vpop.permute.xlu1 %348 }
 0x201   :  { %v325_v54 = vpop.permute.xlu0 %324 }
 0x204   :  { %295 = vadd.xlane.f32.xlu0 %v290_v43  ;;  %v335_v55 = vpop.permute.xlu1 %334 }
 0x205   :  { %v330_v56 = vpop.permute.xlu0 %329 }
 0x211   :  { %358 = vperm.xlu1 %1230, %v53_v44  }
 0x215   :  { %531 = vperm.xlu1 %1230, %v1084_v45  }
 0x219   :  { %541 = vperm.xlu1 %1230, %v1086_v46  }
 0x21a   :  { %353 = vperm.xlu0 %1229, %v52_v47  }
 0x21e   :  { %526 = vperm.xlu0 %1229, %v1083_v48  }
 0x222   :  { %536 = vperm.xlu0 %1229, %v1085_v49  }
 0x289   :  { %v298_v57 = vpop.xlane.xlu1 %297 }
 0x28a   :  { %v303_v58 = vmul.f32 0.0078125, %v298_v57 }
 0x28c   :  { %v307_v59 = vadd.f32 1e-05, %v303_v58 }
 0x28d   :  { %v300_v60 = vpop.xlane.xlu0 %299  ;;  %v294_v61 = vpop.xlane.xlu1 %293 }
 0x28e   :  { %v304_v62 = vmul.f32 0.0078125, %v300_v60  ;;  %v301_v63 = vmul.f32 0.0078125, %v294_v61  ;;  %1249 = vrsqrt.f32 %v307_v59  ;;  %v1119_v60 = vld [vmem:[%s1696_s3 + $0x40] sm:$0xff] }
 0x290   :  { %v308_v3 = vadd.f32 1e-05, %v304_v62  ;;  %v305_v6 = vadd.f32 1e-05, %v301_v63 }
 0x291   :  { %v296_v7 = vpop.xlane.xlu0 %295  ;;  %v359_v20 = vpop.permute.xlu1 %358 }
 0x292   :  { %1251 = vrsqrt.f32 %v308_v3  ;;  %v302_v8 = vmul.f32 0.0078125, %v296_v7 }
 0x293   :  { %1253 = vrsqrt.f32 %v305_v6 }
 0x294   :  { %v306_v9 = vadd.f32 1e-05, %v302_v8 }
 0x295   :  { %v532_v46 = vpop.permute.xlu1 %531 }
 0x296   :  { %1255 = vrsqrt.f32 %v306_v9 }
 0x298   :  { %v1250_v10 = vpop.eup %1249 }
 0x299   :  { %v315_v15 = vmul.f32 %v1250_v10, %v287_v31  ;;  %v354_v4 = vpop.permute.xlu0 %353  ;;  %v542_v48 = vpop.permute.xlu1 %541 }
 0x29b   :  { %v339_v19 = vmul.f32 %v330_v56, %v315_v15  ;;  %v1094_v56 = vld [vmem:[%s1698_s5 + $0x38] sm:$0xff] }
 0x29c   :  { %v1252_v11 = vpop.eup %1251 }
 0x29d   :  { %v1254_v12 = vpop.eup %1253  ;;  %v316_v13 = vmul.f32 %v1252_v11, %v288_v39  ;;  %v1491_v23 = vadd.f32 %v354_v4, %v339_v19  ;;  %v527_v45 = vpop.permute.xlu0 %526 }
 0x29e   :  { %v313_v14 = vmul.f32 %v1254_v12, %v285_v34 }
 0x29f   :  { %v340_v0 = vmul.f32 %v335_v55, %v316_v13 }
 0x2a0   :  { %v1256_v16 = vpop.eup %1255  ;;  %v337_v18 = vmul.f32 %v320_v51, %v313_v14 }
 0x2a1   :  { %v314_v17 = vmul.f32 %v1256_v16, %v286_v40  ;;  %v1485_v21 = vadd.f32 %v359_v20, %v340_v0  ;;  %v537_v47 = vpop.permute.xlu0 %536 }
 0x2a2   :  { %v1487_v2 = vadd.f32 %v344_v52, %v337_v18  ;;  %v580_v52 = vsel %vm571_vm10, 1, %v1297_v5 }
 0x2a3   :  { %v338_v1 = vmul.f32 %v325_v54, %v314_v17  ;;  %v394_v25 = vpack.c.bf16 %v1485_v21, %v1491_v23  ;;  %v584_v55 = vrot.slane %v580_v52, %v1410_v35 }
 0x2a5   :  { %v1489_v22 = vadd.f32 %v349_v53, %v338_v1  ;;  %v561_v53 = vrot.slane %v557_v50, %v1410_v35  ;;  %vm1529_vm12 = vcmp.eq.s32.totalorder %v584_v55, 1 }
 0x2a7   :  { %v393_v24 = vpack.c.bf16 %v1489_v22, %v1487_v2  ;;  %vm1523_vm11 = vcmp.eq.s32.totalorder %v561_v53, 1 }
 0x2a9   :  { %1183 = vmatprep.subr.bf16.mxu1 %v393_v24 }
 0x2aa   :  { %1184 = vmatpush3.bf16.msra.mxu1 %v393_v24 }
 0x2ab   :  { %1185 = vmatprep.subr.bf16.mxu1 %v394_v25 }
 0x2ae   :  { %1186 = vmatpush3.bf16.msra.mxu1 %v394_v25 }
 0x2b1   :  { %1188 = vmatmul.mubr.msk.bf16.vlgmr.msra.gmra.mrb[8].mxu1 %vm86_vm0, %v1238_v26 }
 0x2b2   :  { %1191 = vmatprep.mubr.msk.bf16.mxu1 %vm86_vm0, %v1239_v27 }
 0x2b9   :  { %1192 = vmatmul.mubr.msk.bf16.gmra.mrb[12].mxu1 %vm86_vm0, %v1240_v28 }
 0x2ba   :  { %1195 = vmatprep.mubr.msk.bf16.mxu1 %vm86_vm0, %v1241_v29 }
 0x2c1   :  { %1196 = vmatmul.mubr.msk.bf16.gmra.mrb[16].mxu1 %vm86_vm0, %v1242_v30 }
 0x384   :  { %v1189_v31 = vpop.f32.mrb[8].mxu1 }
 0x385   :  { %553 = vrot.lane.b32.xlu0 %v1189_v31, %s1300_s12  ;;  %v477_v33 = vpop.f32.mrb[9].mxu1 }
 0x386   :  { %v1190_v34 = vpop.f32.mrb[10].mxu1 }
 0x387   :  { %555 = vrot.lane.b32.xlu1 %v1190_v34, %s1300_s12  ;;  %v480_v36 = vpop.f32.mrb[11].mxu1 }
 0x389   :  { %549 = vrot.lane.b32.xlu0 %v477_v33, %s1300_s12 }
 0x38b   :  { %551 = vrot.lane.b32.xlu1 %v480_v36, %s1300_s12  ;;  %v1091_v36 = vld [vmem:[%s1698_s5 + $0x20] sm:$0xff] }
 0x38c   :  { %v1193_v37 = vpop.f32.mrb[12].mxu1 }
 0x38d   :  { %v493_v38 = vpop.f32.mrb[13].mxu1  ;;  %v546_v8 = vadd.f32 %v1193_v37, %v537_v47  ;;  %v1088_v37 = vld [vmem:[%s1697_s4 + $0x28] sm:$0xff] }
 0x38e   :  { %v1194_v39 = vpop.f32.mrb[14].mxu1  ;;  %v544_v59 = vadd.f32 %v527_v45, %v493_v38  ;;  %v1090_v38 = vld [vmem:[%s1697_s4 + $0x38] sm:$0xff] }
 0x38f   :  { %v496_v40 = vpop.f32.mrb[15].mxu1  ;;  %v547_v13 = vadd.f32 %v1194_v39, %v542_v48  ;;  %v1089_v39 = vld [vmem:[%s1697_s4 + $0x30] sm:$0xff] }
 0x390   :  { %v545_v62 = vadd.f32 %v532_v46, %v496_v40 }
 0x394   :  { %v1197_v41 = vpop.f32.mrb[16].mxu1 }
 0x395   :  { %v509_v42 = vpop.f32.mrb[17].mxu1 }
 0x396   :  { %572 = vrot.lane.b32.xlu0 %v509_v42, %s1301_s13  ;;  %v1198_v43 = vpop.f32.mrb[18].mxu1 }
 0x397   :  { %v512_v44 = vpop.f32.mrb[19].mxu1 }
 0x398   :  { %574 = vrot.lane.b32.xlu1 %v512_v44, %s1301_s13 }
 0x39a   :  { %576 = vrot.lane.b32.xlu0 %v1197_v41, %s1301_s13 }
 0x39c   :  { %578 = vrot.lane.b32.xlu1 %v1198_v43, %s1301_s13 }
 0x3f7   :  { %v554_v49 = vpop.permute.xlu0 %553 }
 0x3f8   :  { %v565_v6 = vsel %vm1523_vm11, %v554_v49, 0.0 }
 0x3f9   :  { %v556_v51 = vpop.permute.xlu1 %555  ;;  %v569_v15 = vadd.f32 %v565_v6, %v546_v8 }
 0x3fa   :  { %v566_v9 = vsel %vm1523_vm11, %v556_v51, 0.0 }
 0x3fb   :  { %v550_v54 = vpop.permute.xlu0 %549  ;;  %v570_v18 = vadd.f32 %v566_v9, %v547_v13 }
 0x3fc   :  { %v563_v58 = vsel %vm1523_vm11, %v550_v54, 0.0 }
 0x3fd   :  { %v552_v57 = vpop.permute.xlu1 %551  ;;  %v567_v63 = vadd.f32 %v563_v58, %v544_v59  ;;  %v1122_v58 = vld [vmem:[%s1696_s3 + $0x58] sm:$0xff]  ;;  %v1093_v59 = vld [vmem:[%s1698_s5 + $0x30] sm:$0xff] }
 0x3fe   :  { %v564_v61 = vsel %vm1523_vm11, %v552_v57, 0.0  ;;  %v1120_v57 = vld [vmem:[%s1696_s3 + $0x48] sm:$0xff] }
 0x3ff   :  { %v568_v10 = vadd.f32 %v564_v61, %v545_v62  ;;  %v1121_v61 = vld [vmem:[%s1696_s3 + $0x50] sm:$0xff]  ;;  %v1243_v62 = vld [vmem:[%s1695_s2 + $0x60] sm:$0xff]  }
 0x400   :  { %1203 = vmatprep.mubr.msk.bf16.mxu0 %vm86_vm0, %v1243_v62 }
 0x408   :  { %v573_v3 = vpop.permute.xlu0 %572 }
 0x409   :  { %v586_v7 = vsel %vm1529_vm12, %v573_v3, 0.0 }
 0x40a   :  { %v590_v11 = vadd.f32 %v586_v7, %v567_v63  ;;  %v575_v12 = vpop.permute.xlu1 %574 }
 0x40b   :  { %v587_v14 = vsel %vm1529_vm12, %v575_v12, 0.0 }
 0x40c   :  { %v594_v16 = vadd.f32 %v590_v11, %v1487_v2  ;;  %v591_v0 = vadd.f32 %v587_v14, %v568_v10  ;;  %v577_v17 = vpop.permute.xlu0 %576 }
 0x40d   :  { %v588_v19 = vsel %vm1529_vm12, %v577_v17, 0.0 }
 0x40e   :  { %v595_v1 = vadd.f32 %v591_v0, %v1489_v22  ;;  %v592_v20 = vadd.f32 %v588_v19, %v569_v15  ;;  %v579_v4 = vpop.permute.xlu1 %578  ;;  %vm598_vm13 = vcmp.ge.f32.partialorder %v594_v16, 0.0  ;;  %v602_v24 = vmul.f32 0.2, %v594_v16 }
 0x40f   :  { %v589_v25 = vsel %vm1529_vm12, %v579_v4, 0.0 }
 0x410   :  { %v596_v26 = vadd.f32 %v592_v20, %v1491_v23  ;;  %v593_v27 = vadd.f32 %v589_v25, %v570_v18  ;;  %v606_v28 = vsel %vm598_vm13, %v594_v16, %v602_v24  ;;  %vm599_vm14 = vcmp.ge.f32.partialorder %v595_v1, 0.0  ;;  %v1087_v23 = vld [vmem:[%s1697_s4 + $0x20] sm:$0xff] }
 0x411   :  { %610 = vadd.xlane.f32.xlu0 %v606_v28  ;;  %v603_v2 = vmul.f32 0.2, %v595_v1 }
 0x412   :  { %v597_v29 = vadd.f32 %v593_v27, %v1485_v21  ;;  %vm600_vm15 = vcmp.ge.f32.partialorder %v596_v26, 0.0  ;;  %v604_v30 = vmul.f32 0.2, %v596_v26  ;;  %v1092_v21 = vld [vmem:[%s1698_s5 + $0x28] sm:$0xff] }
 0x413   :  { %v607_v31 = vsel %vm599_vm14, %v595_v1, %v603_v2 }
 0x414   :  { %612 = vadd.xlane.f32.xlu1 %v607_v31  ;;  %v608_v22 = vsel %vm600_vm15, %v596_v26, %v604_v30  ;;  %v605_v33 = vmul.f32 0.2, %v597_v29  ;;  %vm601_vm1 = vcmp.ge.f32.partialorder %v597_v29, 0.0 }
 0x415   :  { %614 = vadd.xlane.f32.xlu0 %v608_v22 }
 0x416   :  { %v609_v34 = vsel %vm601_vm1, %v597_v29, %v605_v33 }
 0x419   :  { %616 = vadd.xlane.f32.xlu0 %v609_v34 }
 0x425   :  { %656 = vperm.xlu1 %1230, %v1087_v23  }
 0x429   :  { %680 = vperm.xlu1 %1230, %v1091_v36  }
 0x42d   :  { %685 = vperm.xlu1 %1230, %v1092_v21  }
 0x42f   :  { %661 = vperm.xlu0 %1229, %v1088_v37  }
 0x431   :  { %671 = vperm.xlu1 %1230, %v1090_v38  }
 0x433   :  { %666 = vperm.xlu0 %1229, %v1089_v39  }
 0x49e   :  { %v611_v40 = vpop.xlane.xlu0 %610 }
 0x49f   :  { %v618_v42 = vmul.f32 0.0078125, %v611_v40  ;;  %v1244_v40 = vld [vmem:[%s1695_s2 + $0x68] sm:$0xff]  }
 0x4a1   :  { %v613_v44 = vpop.xlane.xlu1 %612  ;;  %v622_v47 = vsub.f32 %v606_v28, %v618_v42  ;;  %v1246_v42 = vld [vmem:[%s1695_s2 + $0x78] sm:$0xff]  }
 0x4a2   :  { %v615_v41 = vpop.xlane.xlu0 %614  ;;  %v619_v48 = vmul.f32 0.0078125, %v613_v44  ;;  %v1248_v44 = vld [vmem:[%s1695_s2 + $0x88] sm:$0xff]  }
 0x4a3   :  { %v620_v43 = vmul.f32 0.0078125, %v615_v41  ;;  %v626_v53 = vmul.f32 %v622_v47, %v622_v47  ;;  %v1245_v41 = vld [vmem:[%s1695_s2 + $0x70] sm:$0xff]  }
 0x4a4   :  { %v623_v52 = vsub.f32 %v607_v31, %v619_v48 }
 0x4a5   :  { %v624_v45 = vsub.f32 %v608_v22, %v620_v43  ;;  %v657_v63 = vpop.permute.xlu1 %656  ;;  %v1247_v43 = vld [vmem:[%s1695_s2 + $0x80] sm:$0xff]  }
 0x4a6   :  { %v617_v46 = vpop.xlane.xlu0 %616  ;;  %v627_v55 = vmul.f32 %v623_v52, %v623_v52 }
 0x4a7   :  { %v621_v49 = vmul.f32 0.0078125, %v617_v46  ;;  %v628_v50 = vmul.f32 %v624_v45, %v624_v45 }
 0x4a9   :  { %v625_v51 = vsub.f32 %v609_v34, %v621_v49  ;;  %634 = vadd.xlane.f32.xlu1 %v628_v50  ;;  %v681_v3 = vpop.permute.xlu1 %680 }
 0x4ab   :  { %v629_v54 = vmul.f32 %v625_v51, %v625_v51 }
 0x4ad   :  { %630 = vadd.xlane.f32.xlu1 %v626_v53  ;;  %636 = vadd.xlane.f32.xlu0 %v629_v54  ;;  %v686_v6 = vpop.permute.xlu1 %685 }
 0x4ae   :  { %v662_v7 = vpop.permute.xlu0 %661 }
 0x4b1   :  { %632 = vadd.xlane.f32.xlu0 %v627_v55  ;;  %v672_v8 = vpop.permute.xlu1 %671 }
 0x4b2   :  { %v667_v9 = vpop.permute.xlu0 %666 }
 0x4be   :  { %695 = vperm.xlu1 %1230, %v1094_v56  }
 0x4c2   :  { %868 = vperm.xlu1 %1230, %v1120_v57  }
 0x4c6   :  { %878 = vperm.xlu1 %1230, %v1122_v58  }
 0x4c7   :  { %690 = vperm.xlu0 %1229, %v1093_v59  }
 0x4cb   :  { %863 = vperm.xlu0 %1229, %v1119_v60  }
 0x4cf   :  { %873 = vperm.xlu0 %1229, %v1121_v61  }
 0x536   :  { %v635_v10 = vpop.xlane.xlu1 %634 }
 0x537   :  { %v640_v11 = vmul.f32 0.0078125, %v635_v10 }
 0x539   :  { %v644_v12 = vadd.f32 1e-05, %v640_v11 }
 0x53a   :  { %v637_v13 = vpop.xlane.xlu0 %636  ;;  %v631_v14 = vpop.xlane.xlu1 %630 }
 0x53b   :  { %v641_v15 = vmul.f32 0.0078125, %v637_v13  ;;  %v638_v16 = vmul.f32 0.0078125, %v631_v14  ;;  %1257 = vrsqrt.f32 %v644_v12 }
 0x53d   :  { %v645_v0 = vadd.f32 1e-05, %v641_v15  ;;  %v642_v17 = vadd.f32 1e-05, %v638_v16 }
 0x53e   :  { %v633_v18 = vpop.xlane.xlu0 %632  ;;  %v696_v33 = vpop.permute.xlu1 %695 }
 0x53f   :  { %1259 = vrsqrt.f32 %v645_v0  ;;  %v639_v19 = vmul.f32 0.0078125, %v633_v18 }
 0x540   :  { %1261 = vrsqrt.f32 %v642_v17 }
 0x541   :  { %v643_v1 = vadd.f32 1e-05, %v639_v19 }
 0x542   :  { %v869_v58 = vpop.permute.xlu1 %868 }
 0x543   :  { %1263 = vrsqrt.f32 %v643_v1 }
 0x545   :  { %v1258_v20 = vpop.eup %1257 }
 0x546   :  { %v652_v27 = vmul.f32 %v1258_v20, %v624_v45  ;;  %v691_v21 = vpop.permute.xlu0 %690  ;;  %v879_v60 = vpop.permute.xlu1 %878 }
 0x548   :  { %v676_v31 = vmul.f32 %v667_v9, %v652_v27 }
 0x549   :  { %v1260_v4 = vpop.eup %1259 }
 0x54a   :  { %v1262_v24 = vpop.eup %1261  ;;  %v653_v25 = vmul.f32 %v1260_v4, %v625_v51  ;;  %v1597_v37 = vadd.f32 %v691_v21, %v676_v31  ;;  %v864_v57 = vpop.permute.xlu0 %863 }
 0x54b   :  { %v650_v26 = vmul.f32 %v1262_v24, %v622_v47 }
 0x54c   :  { %v677_v2 = vmul.f32 %v672_v8, %v653_v25 }
 0x54d   :  { %v1264_v28 = vpop.eup %1263  ;;  %v674_v30 = vmul.f32 %v657_v63, %v650_v26 }
 0x54e   :  { %v651_v29 = vmul.f32 %v1264_v28, %v623_v52  ;;  %v1591_v34 = vadd.f32 %v696_v33, %v677_v2  ;;  %v874_v59 = vpop.permute.xlu0 %873 }
 0x54f   :  { %v1593_v23 = vadd.f32 %v681_v3, %v674_v30  ;;  %v917_v3 = vsel %vm908_vm2, 1, %v1297_v5 }
 0x550   :  { %v675_v22 = vmul.f32 %v662_v7, %v651_v29  ;;  %v731_v39 = vpack.c.bf16 %v1591_v34, %v1597_v37  ;;  %v921_v7 = vrot.slane %v917_v3, %v1410_v35 }
 0x552   :  { %v1595_v36 = vadd.f32 %v686_v6, %v675_v22  ;;  %vm1635_vm4 = vcmp.eq.s32.totalorder %v921_v7, 1  ;;  %v1129_v7 = vld [vmem:[%s1698_s5 + $0x50] sm:$0xff] }
 0x554   :  { %v730_v38 = vpack.c.bf16 %v1595_v36, %v1593_v23 }
 0x556   :  { %1199 = vmatprep.subr.bf16.mxu0 %v730_v38 }
 0x557   :  { %1200 = vmatpush3.bf16.msra.mxu0 %v730_v38 }
 0x558   :  { %1201 = vmatprep.subr.bf16.mxu0 %v731_v39 }
 0x55b   :  { %1202 = vmatpush3.bf16.msra.mxu0 %v731_v39 }
 0x55e   :  { %1204 = vmatmul.mubr.msk.bf16.vlgmr.msra.gmra.mrb[4].mxu0 %vm86_vm0, %v1244_v40 }
 0x55f   :  { %1207 = vmatprep.mubr.msk.bf16.mxu0 %vm86_vm0, %v1245_v41 }
 0x566   :  { %1208 = vmatmul.mubr.msk.bf16.gmra.mrb[8].mxu0 %vm86_vm0, %v1246_v42 }
 0x567   :  { %1211 = vmatprep.mubr.msk.bf16.mxu0 %vm86_vm0, %v1247_v43 }
 0x56e   :  { %1212 = vmatmul.mubr.msk.bf16.gmra.mrb[12].mxu0 %vm86_vm0, %v1248_v44  ;;  %vm885_vm0 = vcmp.ge.s32.totalorder %v1407_v32, 4 }
 0x56f   :  { %v894_v62 = vsel %vm885_vm0, 1, %v1297_v5 }
 0x570   :  { %v898_v6 = vrot.slane %v894_v62, %v1410_v35 }
 0x572   :  { %vm1629_vm3 = vcmp.eq.s32.totalorder %v898_v6, 1  ;;  %v1130_v6 = vld [vmem:[%s1698_s5 + $0x58] sm:$0xff] }
 0x631   :  { %v1205_v45 = vpop.f32.mrb[4].mxu0 }
 0x632   :  { %890 = vrot.lane.b32.xlu0 %v1205_v45, %s1302_s23  ;;  %v814_v46 = vpop.f32.mrb[5].mxu0  ;;  %v1125_v45 = vld [vmem:[%s1697_s4 + $0x50] sm:$0xff] }
 0x633   :  { %v1206_v47 = vpop.f32.mrb[6].mxu0 }
 0x634   :  { %892 = vrot.lane.b32.xlu1 %v1206_v47, %s1302_s23  ;;  %v817_v48 = vpop.f32.mrb[7].mxu0  ;;  %v1124_v47 = vld [vmem:[%s1697_s4 + $0x48] sm:$0xff] }
 0x636   :  { %886 = vrot.lane.b32.xlu0 %v814_v46, %s1302_s23  ;;  %v1128_v46 = vld [vmem:[%s1698_s5 + $0x48] sm:$0xff] }
 0x638   :  { %888 = vrot.lane.b32.xlu1 %v817_v48, %s1302_s23  ;;  %v1127_v48 = vld [vmem:[%s1698_s5 + $0x40] sm:$0xff]  ;;  %s1304_s5 = smov [#allocation2]  }
 0x639   :  { %v1209_v49 = vpop.f32.mrb[8].mxu0  ;;  %s1048_s13 = sshll.u32 %s1304_s5, 4  ;;  %s1049_s13 = int_to_ptr.vmem [resolvable:$true] %s1048_s13 }
 0x63a   :  { %v830_v50 = vpop.f32.mrb[9].mxu0  ;;  %v883_v0 = vadd.f32 %v1209_v49, %v874_v59  ;;  %s1273_s3 = scalar_lea.vmem %s1049_s13, 512  ;;  %p1278_p1 = scmp.lt.s32.totalorder %s1049_s13, %s1049_s13 }
 0x63b   :  { %v1210_v51 = vpop.f32.mrb[10].mxu0  ;;  %v881_v12 = vadd.f32 %v864_v57, %v830_v50  ;;  %p1274_p0 = scmp.ne.s32.totalorder %s1049_s13, %s1273_s3  ;;  %p1279_p2 = scmp.lt.s32.totalorder %s1273_s3, %s1273_s3 }
 0x63c   :  { %v833_v52 = vpop.f32.mrb[11].mxu0  ;;  %v884_v4 = vadd.f32 %v1210_v51, %v879_v60 }
 0x63d   :  { %v882_v13 = vadd.f32 %v869_v58, %v833_v52  ;;  %p1280_p3 = por %p1279_p2, %p1278_p1 }
 0x63f   :  { %p1281_p4 = pnand %p1280_p3, %p1274_p0 }
 0x641   :  { %v1213_v53 = vpop.f32.mrb[12].mxu0 }
 0x642   :  { %v846_v54 = vpop.f32.mrb[13].mxu0 }
 0x643   :  { %909 = vrot.lane.b32.xlu0 %v846_v54, %s1303_s24  ;;  %v1214_v55 = vpop.f32.mrb[14].mxu0 }
 0x644   :  { %v849_v56 = vpop.f32.mrb[15].mxu0 }
 0x645   :  { %911 = vrot.lane.b32.xlu1 %v849_v56, %s1303_s24 }
 0x647   :  { %913 = vrot.lane.b32.xlu0 %v1213_v53, %s1303_s24 }
 0x649   :  { %915 = vrot.lane.b32.xlu1 %v1214_v55, %s1303_s24 }
 0x6a4   :  { %v891_v61 = vpop.permute.xlu0 %890 }
 0x6a5   :  { %v902_v35 = vsel %vm1629_vm3, %v891_v61, 0.0 }
 0x6a6   :  { %v893_v63 = vpop.permute.xlu1 %892  ;;  %v906_v24 = vadd.f32 %v902_v35, %v883_v0 }
 0x6a7   :  { %v903_v19 = vsel %vm1629_vm3, %v893_v63, 0.0 }
 0x6a8   :  { %v887_v8 = vpop.permute.xlu0 %886  ;;  %v907_v28 = vadd.f32 %v903_v19, %v884_v4 }
 0x6a9   :  { %v900_v11 = vsel %vm1629_vm3, %v887_v8, 0.0 }
 0x6aa   :  { %v889_v9 = vpop.permute.xlu1 %888  ;;  %v904_v15 = vadd.f32 %v900_v11, %v881_v12 }
 0x6ab   :  { %v901_v5 = vsel %vm1629_vm3, %v889_v9, 0.0 }
 0x6ac   :  { %v905_v17 = vadd.f32 %v901_v5, %v882_v13 }
 0x6b5   :  { %v910_v14 = vpop.permute.xlu0 %909 }
 0x6b6   :  { %v923_v16 = vsel %vm1635_vm4, %v910_v14, 0.0 }
 0x6b7   :  { %v912_v18 = vpop.permute.xlu1 %911  ;;  %v927_v1 = vadd.f32 %v923_v16, %v904_v15 }
 0x6b8   :  { %v924_v20 = vsel %vm1635_vm4, %v912_v18, 0.0 }
 0x6b9   :  { %v928_v25 = vadd.f32 %v924_v20, %v905_v17  ;;  %v914_v26 = vpop.permute.xlu0 %913  ;;  %v931_v31 = vadd.f32 %v927_v1, %v1593_v23 }
 0x6ba   :  { %v925_v27 = vsel %vm1635_vm4, %v914_v26, 0.0 }
 0x6bb   :  { %v932_v2 = vadd.f32 %v928_v25, %v1595_v36  ;;  %v929_v29 = vadd.f32 %v925_v27, %v906_v24  ;;  %v916_v30 = vpop.permute.xlu1 %915  ;;  %v939_v36 = vmul.f32 0.2, %v931_v31  ;;  %vm935_vm7 = vcmp.ge.f32.partialorder %v931_v31, 0.0 }
 0x6bc   :  { %v926_v22 = vsel %vm1635_vm4, %v916_v30, 0.0 }
 0x6bd   :  { %v933_v33 = vadd.f32 %v929_v29, %v1597_v37  ;;  %v930_v21 = vadd.f32 %v926_v22, %v907_v28  ;;  %vm936_vm5 = vcmp.ge.f32.partialorder %v932_v2, 0.0  ;;  %v940_v38 = vmul.f32 0.2, %v932_v2  ;;  %v1123_v37 = vld [vmem:[%s1697_s4 + $0x40] sm:$0xff] }
 0x6be   :  { %v943_v43 = vsel %vm935_vm7, %v931_v31, %v939_v36 }
 0x6bf   :  { %v944_v39 = vsel %vm936_vm5, %v932_v2, %v940_v38  ;;  %vm937_vm6 = vcmp.ge.f32.partialorder %v933_v33, 0.0  ;;  %v941_v40 = vmul.f32 0.2, %v933_v33  ;;  %v934_v41 = vadd.f32 %v930_v21, %v1591_v34  ;;  %v1126_v34 = vld [vmem:[%s1697_s4 + $0x58] sm:$0xff] }
 0x6c0   :  { %949 = vadd.xlane.f32.xlu1 %v944_v39 }
 0x6c1   :  { %v945_v42 = vsel %vm937_vm6, %v933_v33, %v941_v40  ;;  %v942_v23 = vmul.f32 0.2, %v934_v41  ;;  %vm938_vm8 = vcmp.ge.f32.partialorder %v934_v41, 0.0 }
 0x6c2   :  { %951 = vadd.xlane.f32.xlu0 %v945_v42 }
 0x6c3   :  { %v946_v44 = vsel %vm938_vm8, %v934_v41, %v942_v23 }
 0x6c6   :  { %947 = vadd.xlane.f32.xlu0 %v943_v43 }
 0x6ca   :  { %953 = vadd.xlane.f32.xlu0 %v946_v44 }
 0x6d1   :  { %993 = vperm.xlu1 %1230, %v1123_v37  }
 0x6d5   :  { %1003 = vperm.xlu1 %1230, %v1125_v45  }
 0x6d9   :  { %1008 = vperm.xlu1 %1230, %v1126_v34  }
 0x6dd   :  { %1022 = vperm.xlu1 %1230, %v1128_v46  }
 0x6e0   :  { %998 = vperm.xlu0 %1229, %v1124_v47  }
 0x6e4   :  { %1017 = vperm.xlu0 %1229, %v1127_v48  }
 0x74d   :  { %v950_v55 = vpop.xlane.xlu1 %949 }
 0x74e   :  { %v956_v58 = vmul.f32 0.0078125, %v950_v55 }
 0x74f   :  { %v952_v49 = vpop.xlane.xlu0 %951 }
 0x750   :  { %v957_v50 = vmul.f32 0.0078125, %v952_v49  ;;  %v960_v62 = vsub.f32 %v944_v39, %v956_v58 }
 0x751   :  { %v994_v8 = vpop.permute.xlu1 %993 }
 0x752   :  { %v961_v51 = vsub.f32 %v945_v42, %v957_v50  ;;  %v964_v3 = vmul.f32 %v960_v62, %v960_v62 }
 0x753   :  { %v948_v52 = vpop.xlane.xlu0 %947 }
 0x754   :  { %v955_v53 = vmul.f32 0.0078125, %v948_v52  ;;  %v965_v54 = vmul.f32 %v961_v51, %v961_v51 }
 0x755   :  { %v1004_v9 = vpop.permute.xlu1 %1003 }
 0x756   :  { %v959_v56 = vsub.f32 %v943_v43, %v955_v53  ;;  %971 = vadd.xlane.f32.xlu1 %v965_v54 }
 0x757   :  { %v954_v57 = vpop.xlane.xlu0 %953 }
 0x758   :  { %v958_v59 = vmul.f32 0.0078125, %v954_v57  ;;  %v963_v60 = vmul.f32 %v959_v56, %v959_v56 }
 0x759   :  { %v1009_v10 = vpop.permute.xlu1 %1008 }
 0x75a   :  { %v962_v61 = vsub.f32 %v946_v44, %v958_v59  ;;  %967 = vadd.xlane.f32.xlu1 %v963_v60 }
 0x75c   :  { %v966_v63 = vmul.f32 %v962_v61, %v962_v61 }
 0x75d   :  { %v1023_v11 = vpop.permute.xlu1 %1022 }
 0x75e   :  { %973 = vadd.xlane.f32.xlu0 %v966_v63 }
 0x75f   :  { %v999_v32 = vpop.permute.xlu0 %998 }
 0x762   :  { %969 = vadd.xlane.f32.xlu0 %v964_v3 }
 0x763   :  { %v1018_v14 = vpop.permute.xlu0 %1017 }
 0x76b   :  { %1032 = vperm.xlu1 %1230, %v1130_v6  }
 0x778   :  { %1027 = vperm.xlu0 %1229, %v1129_v7  }
 0x7e3   :  { %v972_v12 = vpop.xlane.xlu1 %971 }
 0x7e4   :  { %v977_v5 = vmul.f32 0.0078125, %v972_v12 }
 0x7e6   :  { %v981_v13 = vadd.f32 1e-05, %v977_v5 }
 0x7e7   :  { %v968_v35 = vpop.xlane.xlu1 %967 }
 0x7e8   :  { %1265 = vrsqrt.f32 %v981_v13  ;;  %v975_v15 = vmul.f32 0.0078125, %v968_v35 }
 0x7ea   :  { %v979_v16 = vadd.f32 1e-05, %v975_v15 }
 0x7eb   :  { %v974_v0 = vpop.xlane.xlu0 %973  ;;  %v1033_v38 = vpop.permute.xlu1 %1032 }
 0x7ec   :  { %1267 = vrsqrt.f32 %v979_v16  ;;  %v978_v17 = vmul.f32 0.0078125, %v974_v0 }
 0x7ee   :  { %v982_v18 = vadd.f32 1e-05, %v978_v17 }
 0x7ef   :  { %v970_v19 = vpop.xlane.xlu0 %969 }
 0x7f0   :  { %1269 = vrsqrt.f32 %v982_v18  ;;  %v976_v1 = vmul.f32 0.0078125, %v970_v19 }
 0x7f2   :  { %v1266_v20 = vpop.eup %1265  ;;  %v980_v4 = vadd.f32 1e-05, %v976_v1 }
 0x7f3   :  { %v989_v24 = vmul.f32 %v1266_v20, %v961_v51 }
 0x7f4   :  { %1271 = vrsqrt.f32 %v980_v4 }
 0x7f5   :  { %v1013_v25 = vmul.f32 %v1004_v9, %v989_v24 }
 0x7f6   :  { %v1268_v26 = vpop.eup %1267 }
 0x7f7   :  { %v987_v27 = vmul.f32 %v1268_v26, %v959_v56  ;;  %v1028_v28 = vpop.permute.xlu0 %1027 }
 0x7f8   :  { %v1037_v2 = vadd.f32 %v1028_v28, %v1013_v25 }
 0x7f9   :  { %v1011_v29 = vmul.f32 %v994_v8, %v987_v27 }
 0x7fa   :  { %v1270_v30 = vpop.eup %1269  ;;  %1041 = vst [vmem:[#allocation2 + $0x10] sm:$0xff] %v1037_v2 }
 0x7fb   :  { %v990_v31 = vmul.f32 %v1270_v30, %v962_v61  ;;  %v1035_v22 = vadd.f32 %v1018_v14, %v1011_v29 }
 0x7fd   :  { %v1014_v33 = vmul.f32 %v1009_v10, %v990_v31  ;;  %1039 = vst [vmem:[#allocation2] sm:$0xff] %v1035_v22 }
 0x7fe   :  { %v1272_v21 = vpop.eup %1271 }
 0x7ff   :  { %v1038_v39 = vadd.f32 %v1033_v38, %v1014_v33  ;;  %v988_v40 = vmul.f32 %v1272_v21, %v960_v62 }
 0x801   :  { %1042 = vst [vmem:[#allocation2 + $0x18] sm:$0xff] %v1038_v39  ;;  %v1012_v41 = vmul.f32 %v999_v32, %v988_v40 }
 0x803   :  { %v1036_v42 = vadd.f32 %v1023_v11, %v1012_v41 }
 0x805   :  { %1040 = vst [vmem:[#allocation2 + $0x8] sm:$0xff] %v1036_v42 }
 0x806   :  { %1284 = shalt.err (!%p1281_p4)
}
 0x807   :  { %s1285_s16 = scalar_lea.hbm %s1699_s6, 512 }
 0x808   :  { %p1286_p5 = scmp.ne.s32.totalorder %s1699_s6, %s1285_s16  ;;  %p1289_p6 = scmp.lt.u32.totalorder %s1285_s16, %s1699_s6 }
 0x80a   :  { %p1291_p7 = pnand %p1289_p6, %p1286_p5 }
 0x80c   :  { %1294 = shalt.err (!%p1291_p7)
}
 0x80d   :  { %s1305_s21 = smov 128   ;;  %s1306_s22 = smov 8  }
 0x80e   :  { %1054 = dma.vmem_to_hbm [thread:$0]  %s1049_s13, 512, %s1699_s6, [#allocation3], %s1305_s21, %s1305_s21, %s1306_s22  }
 0x80f   :  { %1295 = dma.done.wait [#allocation3], 512  }
 0x810   :  { %1296 = vsyncadd [#allocation3], 4294966784 }
 0x811   :  { %1058 = vsyncpa [#allocation3], 1 }

</bundles_post_ra>
